<compile_context>
chip_gen: v5e
topology: v5e:2x2
jax: 0.10.0
libtpu: 0.0.40
codegen_flags: <defaults>
</compile_context>

<pallas_src>
import math
import numpy as np
import jax
import jax.numpy as jnp
from jax.experimental import pallas as pl
from jax.experimental.pallas import tpu as pltpu

# ----- module hyper-parameters (globals in the original file) -----
d_model = 32
d_k = 8
d_v = 8
n_heads = 4

LN_EPS = 1e-5      # torch.nn.LayerNorm default
NEG_BIG = -1e30    # additive mask value; exp(NEG_BIG - m) underflows to exactly 0


def multi_head_attention(input_Q, input_K, input_V, W_Q, W_K, W_V, W_fc):
    B, Lq, _ = input_Q.shape
    Lk = input_K.shape[1]
    H = n_heads
    scale = 1.0 / math.sqrt(d_k)

    # ---- host-side (free XLA) layout plumbing ----
    # fold batch*seq onto the row/sublane axis: one matmul covers the batch
    xq2 = input_Q.reshape(B * Lq, d_model).astype(jnp.float32)
    xk2 = input_K.reshape(B * Lk, d_model).astype(jnp.float32)
    xv2 = input_V.reshape(B * Lk, d_model).astype(jnp.float32)
    # pre-transpose weights; fold 1/sqrt(d_k) into W_Q (identical math, 0 kernel cost)
    wq_t = (W_Q.T * scale).astype(jnp.float32)                   # (d_model, H*d_k)
    wk_t = W_K.T.astype(jnp.float32)                             # (d_model, H*d_k)
    wv_t = W_V.T.astype(jnp.float32)                             # (d_model, H*d_v)
    wfc3 = W_fc.T.reshape(H, d_v, d_model).astype(jnp.float32)   # per-head fc weight
    # block-diagonal additive mask over the flattened (B*Lq, B*Lk) score matrix
    row_b = jnp.repeat(jnp.arange(B), Lq)
    col_b = jnp.repeat(jnp.arange(B), Lk)
    mask = jnp.where(row_b[:, None] == col_b[None, :], 0.0, NEG_BIG).astype(jnp.float32)

    def kernel(xq_ref, xk_ref, xv_ref, mask_ref, wq_ref, wk_ref, wv_ref, wfc_ref,
               out_ref, attn_ref):
        xq = xq_ref[...]                                         # (B*Lq, d_model)

        # Fused full-batch projections (scale already folded into wq on host).
        Qf = jnp.dot(xq, wq_ref[...], preferred_element_type=jnp.float32)
        Kf = jnp.dot(xk_ref[...], wk_ref[...], preferred_element_type=jnp.float32)
        Vf = jnp.dot(xv_ref[...], wv_ref[...], preferred_element_type=jnp.float32)

        # Head split only (no per-batch grouping): (B*L, H*d) -> (H, B*L, d).
        def heads(M, dh):
            return jnp.stack([M[:, h * dh:(h + 1) * dh] for h in range(H)], axis=0)

        Qh = heads(Qf, d_k)                                      # (H, B*Lq, d_k)
        Kh = heads(Kf, d_k)                                      # (H, B*Lk, d_k)
        Vh = heads(Vf, d_v)                                      # (H, B*Lk, d_v)

        # One leading-batch einsum per stage over ALL rows; cross-batch pairs are
        # masked to -1e30 so their softmax weight is exactly zero.
        scores = jnp.einsum('hqd,hkd->hqk', Qh, Kh,
                            preferred_element_type=jnp.float32)  # (H, B*Lq, B*Lk)
        scores = scores + mask_ref[...]
        m = jnp.max(scores, axis=-1, keepdims=True)
        p = jnp.exp(scores - m)                                  # exact f32 softmax
        attn = p / jnp.sum(p, axis=-1, keepdims=True)
        attn_ref[...] = attn                                     # diag blocks taken in wrapper

        ctx = jnp.einsum('hqk,hkd->hqd', attn, Vh,
                         preferred_element_type=jnp.float32)     # (H, B*Lq, d_v)

        # Output projection with the head-merge folded into per-head fc weights:
        # y = sum_h ctx[h] @ W_fc_h[h]  ==  context.transpose(1,2).reshape(..) @ W_fc.T
        y = jnp.sum(jnp.einsum('hqd,hdm->hqm', ctx, wfc_ref[...],
                               preferred_element_type=jnp.float32), axis=0) + xq
        # Residual + LayerNorm (fresh nn.LayerNorm: gamma=1, beta=0).
        mu = jnp.mean(y, axis=-1, keepdims=True)
        var = jnp.mean((y - mu) ** 2, axis=-1, keepdims=True)
        out_ref[...] = (y - mu) * jax.lax.rsqrt(var + LN_EPS)

    out_shape = (
        jax.ShapeDtypeStruct((B * Lq, d_model), jnp.float32),
        jax.ShapeDtypeStruct((H, B * Lq, B * Lk), jnp.float32),
    )

    def full(shp):
        return pl.BlockSpec(shp, lambda i: (0,) * len(shp))

    flops = (2 * (B * Lq) * d_model * (H * d_k)
             + 2 * (B * Lk) * d_model * (H * d_k)
             + 2 * (B * Lk) * d_model * (H * d_v)
             + 2 * H * (B * Lq) * (B * Lk) * d_k
             + 2 * H * (B * Lq) * (B * Lk) * d_v
             + 2 * H * (B * Lq) * d_v * d_model)
    bytes_accessed = 4 * ((B * Lq + 2 * B * Lk) * d_model
                          + (B * Lq) * (B * Lk)
                          + 2 * d_model * H * d_k + d_model * H * d_v
                          + H * d_v * d_model
                          + B * Lq * d_model + H * (B * Lq) * (B * Lk))
    cost = pl.CostEstimate(flops=flops,
                           transcendentals=H * (B * Lq) * (B * Lk) + B * Lq,
                           bytes_accessed=bytes_accessed)

    out_flat, attn_full = pl.pallas_call(
        kernel,
        out_shape=out_shape,
        grid_spec=pltpu.PrefetchScalarGridSpec(
            num_scalar_prefetch=0,
            grid=(1,),
            in_specs=[full(xq2.shape), full(xk2.shape), full(xv2.shape),
                      full(mask.shape),
                      full(wq_t.shape), full(wk_t.shape), full(wv_t.shape),
                      full(wfc3.shape)],
            out_specs=[full((B * Lq, d_model)), full((H, B * Lq, B * Lk))]),
        compiler_params=pltpu.CompilerParams(dimension_semantics=("arbitrary",)),
        cost_estimate=cost,
    )(xq2, xk2, xv2, mask, wq_t, wk_t, wv_t, wfc3)

    # ---- free wrapper-side layout plumbing back to PyTorch output shapes ----
    out = out_flat.reshape(B, Lq, d_model)
    a5 = attn_full.reshape(H, B, Lq, B, Lk)
    # keep only the per-batch diagonal blocks -> (B, H, Lq, Lk)
    attn = jnp.stack([a5[:, b, :, b, :] for b in range(B)], axis=0)
    return out, attn


def reference_mha(input_Q, input_K, input_V, W_Q, W_K, W_V, W_fc):
    B, Lq, _ = input_Q.shape
    Q = (input_Q @ W_Q.T).reshape(B, Lq, n_heads, d_k).transpose(0, 2, 1, 3)
    K = (input_K @ W_K.T).reshape(B, -1, n_heads, d_k).transpose(0, 2, 1, 3)
    V = (input_V @ W_V.T).reshape(B, -1, n_heads, d_v).transpose(0, 2, 1, 3)
    scores = jnp.einsum("bhqd,bhkd->bhqk", Q, K) / np.sqrt(d_k)
    attn = jax.nn.softmax(scores, axis=-1)
    ctx = jnp.einsum("bhqk,bhkd->bhqd", attn, V)
    ctx = ctx.transpose(0, 2, 1, 3).reshape(B, Lq, n_heads * d_v)
    out = ctx @ W_fc.T + input_Q
    mu = out.mean(-1, keepdims=True)
    var = ((out - mu) ** 2).mean(-1, keepdims=True)
    return (out - mu) / jnp.sqrt(var + LN_EPS), attn


if __name__ == "__main__":
    key = jax.random.PRNGKey(0)
    k_in, k_q, k_k, k_v, k_fc = jax.random.split(key, 5)

    B, L = 2, 8
    x = jax.random.normal(k_in, (B, L, d_model), dtype=jnp.float32)
    # self-attention style call: Q = K = V = x
    input_Q = input_K = input_V = x

    # Deterministic parameter init (PyTorch nn.Linear weight layout: (out, in))
    def init_w(k, out_f, in_f):
        bound = 1.0 / math.sqrt(in_f)
        return jax.random.uniform(k, (out_f, in_f), jnp.float32, -bound, bound)

    W_Q = init_w(k_q, d_k * n_heads, d_model)
    W_K = init_w(k_k, d_k * n_heads, d_model)
    W_V = init_w(k_v, d_v * n_heads, d_model)
    W_fc = init_w(k_fc, d_model, n_heads * d_v)

    out, attn = multi_head_attention(input_Q, input_K, input_V, W_Q, W_K, W_V, W_fc)
    jax.block_until_ready((out, attn))

    ref_out, ref_attn = reference_mha(input_Q, input_K, input_V, W_Q, W_K, W_V, W_fc)
    np.testing.assert_allclose(np.asarray(out), np.asarray(ref_out), atol=1e-5, rtol=1e-5)
    np.testing.assert_allclose(np.asarray(attn), np.asarray(ref_attn), atol=1e-5, rtol=1e-5)

    print("KERNEL_OK")
</pallas_src>

<mosaic_0001>
module attributes {stable_mosaic.version = 11 : i64} {
  func.func @kernel(%arg0: i32, %arg1: memref<16x32xf32, #tpu.memory_space<vmem>>, %arg2: memref<16x32xf32, #tpu.memory_space<vmem>>, %arg3: memref<16x32xf32, #tpu.memory_space<vmem>>, %arg4: memref<16x16xf32, #tpu.memory_space<vmem>>, %arg5: memref<32x32xf32, #tpu.memory_space<vmem>>, %arg6: memref<32x32xf32, #tpu.memory_space<vmem>>, %arg7: memref<32x32xf32, #tpu.memory_space<vmem>>, %arg8: memref<4x8x32xf32, #tpu.memory_space<vmem>>, %arg9: memref<16x32xf32, #tpu.memory_space<vmem>>, %arg10: memref<4x16x16xf32, #tpu.memory_space<vmem>>) attributes {dimension_semantics = [#tpu.dimension_semantics<arbitrary>], iteration_bounds = array<i64: 1>, scalar_prefetch = 0 : i64, scratch_operands = 0 : i64, tpu.core_type = #tpu.core_type<tc>, window_params = [{pipeline_mode = #tpu.pipeline_mode<synchronous>, transform_indices = @transform_0, window_bounds = array<i64: 16, 32>}, {pipeline_mode = #tpu.pipeline_mode<synchronous>, transform_indices = @transform_1, window_bounds = array<i64: 16, 32>}, {pipeline_mode = #tpu.pipeline_mode<synchronous>, transform_indices = @transform_2, window_bounds = array<i64: 16, 32>}, {pipeline_mode = #tpu.pipeline_mode<synchronous>, transform_indices = @transform_3, window_bounds = array<i64: 16, 16>}, {pipeline_mode = #tpu.pipeline_mode<synchronous>, transform_indices = @transform_4, window_bounds = array<i64: 32, 32>}, {pipeline_mode = #tpu.pipeline_mode<synchronous>, transform_indices = @transform_5, window_bounds = array<i64: 32, 32>}, {pipeline_mode = #tpu.pipeline_mode<synchronous>, transform_indices = @transform_6, window_bounds = array<i64: 32, 32>}, {pipeline_mode = #tpu.pipeline_mode<synchronous>, transform_indices = @transform_7, window_bounds = array<i64: 4, 8, 32>}, {pipeline_mode = #tpu.pipeline_mode<synchronous>, transform_indices = @transform_8, window_bounds = array<i64: 16, 32>}, {pipeline_mode = #tpu.pipeline_mode<synchronous>, transform_indices = @transform_9, window_bounds = array<i64: 4, 16, 16>}]} {
    %c0 = arith.constant 0 : index
    %c0_0 = arith.constant 0 : index
    %0 = vector.load %arg1[%c0, %c0_0] : memref<16x32xf32, #tpu.memory_space<vmem>>, vector<16x32xf32>
    %c0_1 = arith.constant 0 : index
    %c0_2 = arith.constant 0 : index
    %1 = vector.load %arg5[%c0_1, %c0_2] : memref<32x32xf32, #tpu.memory_space<vmem>>, vector<32x32xf32>
    %cst = arith.constant dense<0.000000e+00> : vector<16x32xf32>
    %2 = tpu.matmul %0, %1, %cst {dimension_numbers = #tpu.dot_dimension_numbers<[1], [0], [0], [1], [0, 0, 1, 1], [], []>} : vector<16x32xf32>, vector<32x32xf32>, vector<16x32xf32> -> vector<16x32xf32>
    %c0_3 = arith.constant 0 : index
    %c0_4 = arith.constant 0 : index
    %3 = vector.load %arg2[%c0_3, %c0_4] : memref<16x32xf32, #tpu.memory_space<vmem>>, vector<16x32xf32>
    %c0_5 = arith.constant 0 : index
    %c0_6 = arith.constant 0 : index
    %4 = vector.load %arg6[%c0_5, %c0_6] : memref<32x32xf32, #tpu.memory_space<vmem>>, vector<32x32xf32>
    %cst_7 = arith.constant dense<0.000000e+00> : vector<16x32xf32>
    %5 = tpu.matmul %3, %4, %cst_7 {dimension_numbers = #tpu.dot_dimension_numbers<[1], [0], [0], [1], [0, 0, 1, 1], [], []>} : vector<16x32xf32>, vector<32x32xf32>, vector<16x32xf32> -> vector<16x32xf32>
    %c0_8 = arith.constant 0 : index
    %c0_9 = arith.constant 0 : index
    %6 = vector.load %arg3[%c0_8, %c0_9] : memref<16x32xf32, #tpu.memory_space<vmem>>, vector<16x32xf32>
    %c0_10 = arith.constant 0 : index
    %c0_11 = arith.constant 0 : index
    %7 = vector.load %arg7[%c0_10, %c0_11] : memref<32x32xf32, #tpu.memory_space<vmem>>, vector<32x32xf32>
    %cst_12 = arith.constant dense<0.000000e+00> : vector<16x32xf32>
    %8 = tpu.matmul %6, %7, %cst_12 {dimension_numbers = #tpu.dot_dimension_numbers<[1], [0], [0], [1], [0, 0, 1, 1], [], []>} : vector<16x32xf32>, vector<32x32xf32>, vector<16x32xf32> -> vector<16x32xf32>
    %9 = vector.extract_strided_slice %2 {offsets = [0, 0], sizes = [16, 8], strides = [1, 1]} : vector<16x32xf32> to vector<16x8xf32>
    %10 = vector.extract_strided_slice %2 {offsets = [0, 8], sizes = [16, 8], strides = [1, 1]} : vector<16x32xf32> to vector<16x8xf32>
    %11 = vector.extract_strided_slice %2 {offsets = [0, 16], sizes = [16, 8], strides = [1, 1]} : vector<16x32xf32> to vector<16x8xf32>
    %12 = vector.extract_strided_slice %2 {offsets = [0, 24], sizes = [16, 8], strides = [1, 1]} : vector<16x32xf32> to vector<16x8xf32>
    %13 = vector.shape_cast %9 : vector<16x8xf32> to vector<1x16x8xf32>
    %14 = vector.shape_cast %10 : vector<16x8xf32> to vector<1x16x8xf32>
    %15 = vector.shape_cast %11 : vector<16x8xf32> to vector<1x16x8xf32>
    %16 = vector.shape_cast %12 : vector<16x8xf32> to vector<1x16x8xf32>
    %17 = tpu.concatenate %13, %14, %15, %16 in 0 : vector<1x16x8xf32>, vector<1x16x8xf32>, vector<1x16x8xf32>, vector<1x16x8xf32> -> vector<4x16x8xf32>
    %18 = vector.extract_strided_slice %5 {offsets = [0, 0], sizes = [16, 8], strides = [1, 1]} : vector<16x32xf32> to vector<16x8xf32>
    %19 = vector.extract_strided_slice %5 {offsets = [0, 8], sizes = [16, 8], strides = [1, 1]} : vector<16x32xf32> to vector<16x8xf32>
    %20 = vector.extract_strided_slice %5 {offsets = [0, 16], sizes = [16, 8], strides = [1, 1]} : vector<16x32xf32> to vector<16x8xf32>
    %21 = vector.extract_strided_slice %5 {offsets = [0, 24], sizes = [16, 8], strides = [1, 1]} : vector<16x32xf32> to vector<16x8xf32>
    %22 = vector.shape_cast %18 : vector<16x8xf32> to vector<1x16x8xf32>
    %23 = vector.shape_cast %19 : vector<16x8xf32> to vector<1x16x8xf32>
    %24 = vector.shape_cast %20 : vector<16x8xf32> to vector<1x16x8xf32>
    %25 = vector.shape_cast %21 : vector<16x8xf32> to vector<1x16x8xf32>
    %26 = tpu.concatenate %22, %23, %24, %25 in 0 : vector<1x16x8xf32>, vector<1x16x8xf32>, vector<1x16x8xf32>, vector<1x16x8xf32> -> vector<4x16x8xf32>
    %27 = vector.extract_strided_slice %8 {offsets = [0, 0], sizes = [16, 8], strides = [1, 1]} : vector<16x32xf32> to vector<16x8xf32>
    %28 = vector.extract_strided_slice %8 {offsets = [0, 8], sizes = [16, 8], strides = [1, 1]} : vector<16x32xf32> to vector<16x8xf32>
    %29 = vector.extract_strided_slice %8 {offsets = [0, 16], sizes = [16, 8], strides = [1, 1]} : vector<16x32xf32> to vector<16x8xf32>
    %30 = vector.extract_strided_slice %8 {offsets = [0, 24], sizes = [16, 8], strides = [1, 1]} : vector<16x32xf32> to vector<16x8xf32>
    %31 = vector.shape_cast %27 : vector<16x8xf32> to vector<1x16x8xf32>
    %32 = vector.shape_cast %28 : vector<16x8xf32> to vector<1x16x8xf32>
    %33 = vector.shape_cast %29 : vector<16x8xf32> to vector<1x16x8xf32>
    %34 = vector.shape_cast %30 : vector<16x8xf32> to vector<1x16x8xf32>
    %35 = tpu.concatenate %31, %32, %33, %34 in 0 : vector<1x16x8xf32>, vector<1x16x8xf32>, vector<1x16x8xf32>, vector<1x16x8xf32> -> vector<4x16x8xf32>
    "tpu.trace_start"() <{level = 10 : i32, message = "hqd,hkd->hqk"}> : () -> ()
    %cst_13 = arith.constant dense<0.000000e+00> : vector<4x16x16xf32>
    %36 = tpu.matmul %17, %26, %cst_13 {dimension_numbers = #tpu.dot_dimension_numbers<[2], [2], [1], [1], [0, 0, 0, 1, 1, 1], [0], [0]>} : vector<4x16x8xf32>, vector<4x16x8xf32>, vector<4x16x16xf32> -> vector<4x16x16xf32>
    "tpu.trace_stop"() : () -> ()
    %c0_14 = arith.constant 0 : index
    %c0_15 = arith.constant 0 : index
    %37 = vector.load %arg4[%c0_14, %c0_15] : memref<16x16xf32, #tpu.memory_space<vmem>>, vector<16x16xf32>
    %38 = vector.shape_cast %37 : vector<16x16xf32> to vector<1x16x16xf32>
    %39 = vector.broadcast %38 : vector<1x16x16xf32> to vector<4x16x16xf32>
    %40 = arith.addf %36, %39 : vector<4x16x16xf32>
    %cst_16 = arith.constant dense<0xFF800000> : vector<4x16xf32>
    %41 = vector.multi_reduction <maximumf>, %40, %cst_16 [2] : vector<4x16x16xf32> to vector<4x16xf32>
    %42 = vector.shape_cast %41 : vector<4x16xf32> to vector<4x16x1xf32>
    %43 = vector.broadcast %42 : vector<4x16x1xf32> to vector<4x16x16xf32>
    %44 = arith.subf %40, %43 : vector<4x16x16xf32>
    %45 = math.exp %44 : vector<4x16x16xf32>
    %cst_17 = arith.constant dense<0.000000e+00> : vector<4x16xf32>
    %46 = vector.multi_reduction <add>, %45, %cst_17 [2] : vector<4x16x16xf32> to vector<4x16xf32>
    %47 = vector.shape_cast %46 : vector<4x16xf32> to vector<4x16x1xf32>
    %48 = vector.broadcast %47 : vector<4x16x1xf32> to vector<4x16x16xf32>
    %49 = arith.divf %45, %48 : vector<4x16x16xf32>
    %c0_18 = arith.constant 0 : index
    %c0_19 = arith.constant 0 : index
    %c0_20 = arith.constant 0 : index
    %50 = vector.load %arg10[%c0_18, %c0_19, %c0_20] : memref<4x16x16xf32, #tpu.memory_space<vmem>>, vector<4x16x16xf32>
    tpu.vector_store %arg10[%c0_18, %c0_19, %c0_20], %49 {strides = array<i32>} : memref<4x16x16xf32, #tpu.memory_space<vmem>>, vector<4x16x16xf32>,
    "tpu.trace_start"() <{level = 10 : i32, message = "hqk,hkd->hqd"}> : () -> ()
    %cst_21 = arith.constant dense<0.000000e+00> : vector<4x16x8xf32>
    %51 = tpu.matmul %49, %35, %cst_21 {dimension_numbers = #tpu.dot_dimension_numbers<[2], [1], [1], [2], [0, 0, 0, 1, 1, 2], [0], [0]>} : vector<4x16x16xf32>, vector<4x16x8xf32>, vector<4x16x8xf32> -> vector<4x16x8xf32>
    "tpu.trace_stop"() : () -> ()
    %c0_22 = arith.constant 0 : index
    %c0_23 = arith.constant 0 : index
    %c0_24 = arith.constant 0 : index
    %52 = vector.load %arg8[%c0_22, %c0_23, %c0_24] : memref<4x8x32xf32, #tpu.memory_space<vmem>>, vector<4x8x32xf32>
    "tpu.trace_start"() <{level = 10 : i32, message = "hqd,hdm->hqm"}> : () -> ()
    %cst_25 = arith.constant dense<0.000000e+00> : vector<4x16x32xf32>
    %53 = tpu.matmul %51, %52, %cst_25 {dimension_numbers = #tpu.dot_dimension_numbers<[2], [1], [1], [2], [0, 0, 0, 1, 1, 2], [0], [0]>} : vector<4x16x8xf32>, vector<4x8x32xf32>, vector<4x16x32xf32> -> vector<4x16x32xf32>
    "tpu.trace_stop"() : () -> ()
    %cst_26 = arith.constant dense<0.000000e+00> : vector<16x32xf32>
    %54 = vector.multi_reduction <add>, %53, %cst_26 [0] : vector<4x16x32xf32> to vector<16x32xf32>
    %55 = arith.addf %54, %0 : vector<16x32xf32>
    %cst_27 = arith.constant dense<0.000000e+00> : vector<16xf32>
    %56 = vector.multi_reduction <add>, %55, %cst_27 [1] : vector<16x32xf32> to vector<16xf32>
    %57 = vector.shape_cast %56 : vector<16xf32> to vector<16x1xf32>
    %cst_28 = arith.constant 3.200000e+01 : f32
    %58 = vector.broadcast %cst_28 : f32 to vector<16x1xf32>
    %59 = arith.divf %57, %58 : vector<16x1xf32>
    %60 = vector.broadcast %59 : vector<16x1xf32> to vector<16x32xf32>
    %61 = arith.subf %55, %60 : vector<16x32xf32>
    %62 = arith.mulf %61, %61 : vector<16x32xf32>
    %cst_29 = arith.constant dense<0.000000e+00> : vector<16xf32>
    %63 = vector.multi_reduction <add>, %62, %cst_29 [1] : vector<16x32xf32> to vector<16xf32>
    %64 = vector.shape_cast %63 : vector<16xf32> to vector<16x1xf32>
    %cst_30 = arith.constant 3.200000e+01 : f32
    %65 = vector.broadcast %cst_30 : f32 to vector<16x1xf32>
    %66 = arith.divf %64, %65 : vector<16x1xf32>
    %67 = vector.broadcast %59 : vector<16x1xf32> to vector<16x32xf32>
    %68 = arith.subf %55, %67 : vector<16x32xf32>
    %cst_31 = arith.constant 9.99999974E-6 : f32
    %69 = vector.broadcast %cst_31 : f32 to vector<16x1xf32>
    %70 = arith.addf %66, %69 : vector<16x1xf32>
    %71 = math.rsqrt %70 : vector<16x1xf32>
    %72 = vector.broadcast %71 : vector<16x1xf32> to vector<16x32xf32>
    %73 = arith.mulf %68, %72 : vector<16x32xf32>
    %c0_32 = arith.constant 0 : index
    %c0_33 = arith.constant 0 : index
    %74 = vector.load %arg9[%c0_32, %c0_33] : memref<16x32xf32, #tpu.memory_space<vmem>>, vector<16x32xf32>
    tpu.vector_store %arg9[%c0_32, %c0_33], %73 {strides = array<i32>} : memref<16x32xf32, #tpu.memory_space<vmem>>, vector<16x32xf32>,
    return
  }
  func.func @transform_0(%arg0: i32) -> (i32, i32) {
    %c0_i32 = arith.constant 0 : i32
    %c0_i32_0 = arith.constant 0 : i32
    %c0_i32_1 = arith.constant 0 : i32
    return %c0_i32, %c0_i32_0 : i32, i32
  }
  func.func @transform_1(%arg0: i32) -> (i32, i32) {
    %c0_i32 = arith.constant 0 : i32
    %c0_i32_0 = arith.constant 0 : i32
    %c0_i32_1 = arith.constant 0 : i32
    return %c0_i32, %c0_i32_0 : i32, i32
  }
  func.func @transform_2(%arg0: i32) -> (i32, i32) {
    %c0_i32 = arith.constant 0 : i32
    %c0_i32_0 = arith.constant 0 : i32
    %c0_i32_1 = arith.constant 0 : i32
    return %c0_i32, %c0_i32_0 : i32, i32
  }
  func.func @transform_3(%arg0: i32) -> (i32, i32) {
    %c0_i32 = arith.constant 0 : i32
    %c0_i32_0 = arith.constant 0 : i32
    %c0_i32_1 = arith.constant 0 : i32
    return %c0_i32, %c0_i32_0 : i32, i32
  }
  func.func @transform_4(%arg0: i32) -> (i32, i32) {
    %c0_i32 = arith.constant 0 : i32
    %c0_i32_0 = arith.constant 0 : i32
    %c0_i32_1 = arith.constant 0 : i32
    return %c0_i32, %c0_i32_0 : i32, i32
  }
  func.func @transform_5(%arg0: i32) -> (i32, i32) {
    %c0_i32 = arith.constant 0 : i32
    %c0_i32_0 = arith.constant 0 : i32
    %c0_i32_1 = arith.constant 0 : i32
    return %c0_i32, %c0_i32_0 : i32, i32
  }
  func.func @transform_6(%arg0: i32) -> (i32, i32) {
    %c0_i32 = arith.constant 0 : i32
    %c0_i32_0 = arith.constant 0 : i32
    %c0_i32_1 = arith.constant 0 : i32
    return %c0_i32, %c0_i32_0 : i32, i32
  }
  func.func @transform_7(%arg0: i32) -> (i32, i32, i32) {
    %c0_i32 = arith.constant 0 : i32
    %c0_i32_0 = arith.constant 0 : i32
    %c0_i32_1 = arith.constant 0 : i32
    %c0_i32_2 = arith.constant 0 : i32
    return %c0_i32, %c0_i32_0, %c0_i32_1 : i32, i32, i32
  }
  func.func @transform_8(%arg0: i32) -> (i32, i32) {
    %c0_i32 = arith.constant 0 : i32
    %c0_i32_0 = arith.constant 0 : i32
    %c0_i32_1 = arith.constant 0 : i32
    return %c0_i32, %c0_i32_0 : i32, i32
  }
  func.func @transform_9(%arg0: i32) -> (i32, i32, i32) {
    %c0_i32 = arith.constant 0 : i32
    %c0_i32_0 = arith.constant 0 : i32
    %c0_i32_1 = arith.constant 0 : i32
    %c0_i32_2 = arith.constant 0 : i32
    return %c0_i32, %c0_i32_0, %c0_i32_1 : i32, i32, i32
  }
}

</mosaic_0001>

<bundles_post_ra>
// kernel: tpu_custom_call.1
= control target key start
LH: loop header
LB: loop body
LE: loop exit
PB: predicated region body
PF: predicated region fallthrough
CT: control target
= control target key end

     0   :  { %15 = vsyncpa [#allocation3], 0  ;;  %s1659_s0 = inlined_call_operand.hbm [shape: f32[16,32], index: 0, kind: input, shape index: {}]   ;;  %s1660_s1 = inlined_call_operand.hbm [shape: f32[16,32], index: 1, kind: input, shape index: {}]   ;;  %s1661_s2 = inlined_call_operand.hbm [shape: f32[16,32], index: 2, kind: input, shape index: {}]   ;;  %s1662_s3 = inlined_call_operand.hbm [shape: f32[16,16], index: 3, kind: input, shape index: {}]   ;;  %s1663_s4 = inlined_call_operand.hbm [shape: f32[32,32], index: 4, kind: input, shape index: {}]   ;;  %s1664_s5 = inlined_call_operand.hbm [shape: f32[32,32], index: 5, kind: input, shape index: {}]   ;;  %s1665_s6 = inlined_call_operand.hbm [shape: f32[32,32], index: 6, kind: input, shape index: {}]   ;;  %s1666_s7 = inlined_call_operand.hbm [shape: f32[4,8,32], index: 7, kind: input, shape index: {}]   ;;  %s1667_s8 = inlined_call_operand.hbm [shape: f32[16,32], index: 8, kind: output, shape index: {0}]   ;;  %s1668_s9 = inlined_call_operand.hbm [shape: f32[4,16,16], index: 9, kind: output, shape index: {1}]  }
   0x1   :  { %16 = vsyncpa [#allocation6], 0 }
   0x2   :  { %17 = vsyncpa [#allocation9], 0 }
   0x3   :  { %18 = vsyncpa [#allocation12], 0 }
   0x4   :  { %19 = vsyncpa [#allocation15], 0 }
   0x5   :  { %20 = vsyncpa [#allocation4], 0 }
   0x6   :  { %21 = vsyncpa [#allocation18], 0  ;;  %s39_s11 = sshll.u32 %s1660_s1, 4  ;;  %s1351_s12 = smov [#allocation5]   ;;  %s40_s11 = int_to_ptr.hbm [resolvable:$true] %s39_s11 }
   0x7   :  { %s41_s13 = sshll.u32 %s1351_s12, 4  ;;  %s65_s16 = sshll.u32 %s1662_s3, 4  ;;  %s42_s13 = int_to_ptr.vmem [resolvable:$true] %s41_s13  ;;  %s66_s16 = int_to_ptr.hbm [resolvable:$true] %s65_s16 }
   0x8   :  { %s1352_s17 = smov 128   ;;  %s1353_s18 = smov 8  }
   0x9   :  { %47 = dma.hbm_to_vmem [thread:$0]  %s40_s11, 256, %s42_s13, [#allocation6], %s1352_s17, %s1352_s17, %s1353_s18  }
   0xa   :  { %s1354_s19 = smov [#allocation8]   ;;  %s91_s1 = sshll.u32 %s1664_s5, 4  ;;  %s92_s1 = int_to_ptr.hbm [resolvable:$true] %s91_s1 }
   0xb   :  { %s67_s20 = sshll.u32 %s1354_s19, 4  ;;  %s26_s24 = sshll.u32 %s1659_s0, 4  ;;  %s68_s20 = int_to_ptr.vmem [resolvable:$true] %s67_s20  ;;  %s27_s24 = int_to_ptr.hbm [resolvable:$true] %s26_s24 }
   0xc   :  { %73 = dma.hbm_to_vmem [thread:$0]  %s66_s16, 256, %s68_s20, [#allocation9], %s1352_s17, %s1352_s17, %s1353_s18  }
   0xd   :  { %s1355_s25 = smov [#allocation11]   ;;  %s1356_s27 = smov [#allocation2]  }
   0xe   :  { %s93_s26 = sshll.u32 %s1355_s25, 4  ;;  %s28_s5 = sshll.u32 %s1356_s27, 4  ;;  %s94_s26 = int_to_ptr.vmem [resolvable:$true] %s93_s26  ;;  %s29_s5 = int_to_ptr.vmem [resolvable:$true] %s28_s5 }
   0xf   :  { %99 = dma.hbm_to_vmem [thread:$0]  %s92_s1, 512, %s94_s26, [#allocation12], %s1352_s17, %s1352_s17, %s1353_s18  }
  0x10   :  { %s52_s30 = sshll.u32 %s1661_s2, 4  ;;  %s78_s11 = sshll.u32 %s1663_s4, 4  ;;  %s53_s30 = int_to_ptr.hbm [resolvable:$true] %s52_s30  ;;  %s79_s11 = int_to_ptr.hbm [resolvable:$true] %s78_s11 }
  0x11   :  { %34 = dma.hbm_to_vmem [thread:$0]  %s27_s24, 256, %s29_s5, [#allocation3], %s1352_s17, %s1352_s17, %s1353_s18  }
  0x12   :  { %s1357_s12 = smov [#allocation7]   ;;  %s1358_s14 = smov [#allocation10]  }
  0x13   :  { %s54_s13 = sshll.u32 %s1357_s12, 4  ;;  %s80_s2 = sshll.u32 %s1358_s14, 4  ;;  %s55_s13 = int_to_ptr.vmem [resolvable:$true] %s54_s13  ;;  %s81_s2 = int_to_ptr.vmem [resolvable:$true] %s80_s2 }
  0x14   :  { %60 = dma.hbm_to_vmem [thread:$0]  %s53_s30, 256, %s55_s13, [#allocation6], %s1352_s17, %s1352_s17, %s1353_s18  }
  0x15   :  { %s104_s19 = sshll.u32 %s1665_s6, 4  ;;  %s117_s21 = sshll.u32 %s1666_s7, 4  ;;  %s105_s19 = int_to_ptr.hbm [resolvable:$true] %s104_s19  ;;  %s118_s21 = int_to_ptr.hbm [resolvable:$true] %s117_s21 }
  0x16   :  { %86 = dma.hbm_to_vmem [thread:$0]  %s79_s11, 512, %s81_s2, [#allocation9], %s1352_s17, %s1352_s17, %s1353_s18  }
  0x17   :  { %s1359_s22 = smov [#allocation13]   ;;  %s1360_s3 = smov [#allocation14]  }
  0x18   :  { %s106_s1 = sshll.u32 %s1359_s22, 4  ;;  %s119_s6 = sshll.u32 %s1360_s3, 4  ;;  %s107_s1 = int_to_ptr.vmem [resolvable:$true] %s106_s1  ;;  %s120_s6 = int_to_ptr.vmem [resolvable:$true] %s119_s6 }
  0x19   :  { %112 = dma.hbm_to_vmem [thread:$0]  %s105_s19, 512, %s107_s1, [#allocation12], %s1352_s17, %s1352_s17, %s1353_s18  }
  0x1a   :  { %125 = dma.hbm_to_vmem [thread:$0]  %s118_s21, 512, %s120_s6, [#allocation15], %s1352_s17, %s1352_s17, %s1353_s18  }
  0x1b   :  { %1337 = dma.done.wait [#allocation3], 256  }
  0x1c   :  { %1338 = vsyncadd [#allocation3], 4294967040 }
  0x1d   :  { %1339 = dma.done.wait [#allocation6], 512  }
  0x1e   :  { %1340 = vsyncadd [#allocation6], 4294966784 }
  0x1f   :  { %1341 = dma.done.wait [#allocation9], 768  }
  0x20   :  { %1342 = vsyncadd [#allocation9], 4294966528 }
  0x21   :  { %1343 = dma.done.wait [#allocation12], 1024  }
  0x22   :  { %1344 = vsyncadd [#allocation12], 4294966272 }
  0x23   :  { %1345 = dma.done.wait [#allocation15], 512  }
  0x24   :  { %1346 = vsyncadd [#allocation15], 4294966784  ;;  %v163_v0 = vld [vmem:[#allocation10 + $0x18] sm:$0xff]  ;;  %v162_v2 = vld [vmem:[#allocation10 + $0x10] sm:$0xff]  ;;  %vm164_vm0 = vcmask 261120   ;;  %s1361_s7 = smov 104  }
  0x25   :  { %v199_v1 = vld [vmem:[#allocation11 + $0x18] sm:$0xff]  ;;  %183 = vmatpush.msra.mxu0 %v163_v0  ;;  %1024 = vmatpush.msra.mxu3 %v163_v0  ;;  %v198_v3 = vld [vmem:[#allocation11 + $0x10] sm:$0xff]  ;;  %v161_v4 = vld [vmem:[#allocation10 + $0x8] sm:$0xff]  ;;  %vm314_vm1 = vcmask 64512   ;;  %s1362_s23 = smov 120   ;;  %s1363_s24 = smov 112  }
  0x26   :  { %218 = vmatpush.msra.mxu1 %v199_v1  ;;  %v197_v5 = vld [vmem:[#allocation11 + $0x8] sm:$0xff]  ;;  %v160_v6 = vld [vmem:[#allocation10] sm:$0xff]  ;;  %v194_v10 = vld [vmem:[#allocation5] sm:$0xff]  ;;  %vm439_vm2 = vcmask 130048   ;;  %s1365_s25 = smov [#allocation17]   ;;  %s964_s28 = sshll.u32 %s1668_s9, 4  ;;  %s965_s28 = int_to_ptr.hbm [resolvable:$true] %s964_s28 }
  0x27   :  { %184 = vmatpush.msra.mxu0 %v162_v2  ;;  %1025 = vmatpush.msra.mxu3 %v162_v2  ;;  %v196_v7 = vld [vmem:[#allocation11] sm:$0xff]  ;;  %v1467_v9 = vld [vmem:[#allocation2 + $0x8] sm:$0xff]  ;;  %v195_v11 = vld [vmem:[#allocation5 + $0x8] sm:$0xff]  ;;  %s962_s26 = sshll.u32 %s1365_s25, 4  ;;  %s1366_s9 = smov [#allocation16]   ;;  %s963_s26 = int_to_ptr.vmem [resolvable:$true] %s962_s26 }
  0x28   :  { %219 = vmatpush.msra.mxu1 %v198_v3  ;;  %v1465_v8 = vld [vmem:[#allocation2] sm:$0xff]  ;;  %v234_v16 = vld [vmem:[#allocation13 + $0x18] sm:$0xff]  ;;  %v233_v17 = vld [vmem:[#allocation13 + $0x10] sm:$0xff]  ;;  %s949_s29 = sshll.u32 %s1366_s9, 4  ;;  %s951_s10 = sshll.u32 %s1667_s8, 4  ;;  %s950_s29 = int_to_ptr.vmem [resolvable:$true] %s949_s29  ;;  %s952_s10 = int_to_ptr.hbm [resolvable:$true] %s951_s10 }
  0x29   :  { %185 = vmatpush.msra.mxu0 %v161_v4  ;;  %1026 = vmatpush.msra.mxu3 %v161_v4  ;;  %v232_v18 = vld [vmem:[#allocation13 + $0x8] sm:$0xff]  ;;  %v231_v19 = vld [vmem:[#allocation13] sm:$0xff]  ;;  %v312_v31 = vld [vmem:[#allocation8] sm:$0xff] }
  0x2a   :  { %220 = vmatpush.msra.mxu1 %v197_v5  ;;  %253 = vmatpush.msra.mxu2 %v234_v16  ;;  %v229_v20 = vld [vmem:[#allocation7] sm:$0xff]  ;;  %v230_v21 = vld [vmem:[#allocation7 + $0x8] sm:$0xff]  ;;  %v313_v37 = vld [vmem:[#allocation8 + $0x8] sm:$0xff] }
  0x2b   :  { %186 = vmatpush.msra.mxu0 %v160_v6  ;;  %1027 = vmatpush.msra.mxu3 %v160_v6 }
  0x2c   :  { %221 = vmatpush.msra.mxu1 %v196_v7  ;;  %986 = vmatmul.msk.f32.vlgmr.msra.gmra.mxu0 %vm164_vm0, %v1465_v8 }
  0x2d   :  { %987 = vmatmul.msk.f32.vlgmr.msra.gmra.mxu3 %vm164_vm0, %v1467_v9  ;;  %988 = vmatmul.msk.f32.vlgmr.msra.gmra.mxu1 %vm164_vm0, %v194_v10 }
  0x2e   :  { %254 = vmatpush.msra.mxu2 %v233_v17 }
  0x30   :  { %255 = vmatpush.msra.mxu2 %v232_v18 }
  0x32   :  { %256 = vmatpush.msra.mxu2 %v231_v19 }
  0x33   :  { %990 = vmatmul.msk.f32.vlgmr.msra.gmra.mxu2 %vm164_vm0, %v229_v20 }
  0x35   :  { %989 = vmatmul.msk.f32.gmra.mxu1 %vm164_vm0, %v195_v11 }
  0x3b   :  { %991 = vmatmul.msk.f32.gmra.mxu2 %vm164_vm0, %v230_v21 }
  0xa9   :  { %v188_v12 = vpop.f32.mrf.mxu0 }
  0xaa   :  { %v223_v13 = vpop.f32.mrf.mxu1  ;;  %274 = vrot.lane.b32.xlu1 %v188_v12, %s1361_s7 }
  0xb0   :  { %v191_v14 = vpop.f32.mrf.mxu3 }
  0xb1   :  { %276 = vrot.lane.b32.xlu2 %v191_v14, %s1361_s7 }
  0xb2   :  { %v226_v15 = vpop.f32.mrf.mxu1 }
  0xb3   :  { %290 = vrot.lane.b32.xlu0 %v226_v15, %s1361_s7  ;;  %992 = vmatpush.xpose.msk.msrb.mxu3 %vm314_vm1, %v226_v15 }
  0xb4   :  { %282 = vrot.lane.b32.xlu1 %v226_v15, %s1362_s23 }
  0xb6   :  { %v258_v42 = vpop.f32.mrf.mxu2 }
  0xb7   :  { %993 = vmatpush.xpose.msk.msrb.mxu3 %vm314_vm1, %v223_v13 }
  0xb9   :  { %286 = vrot.lane.b32.xlu2 %v226_v15, %s1363_s24 }
  0xba   :  { %994 = vmatmul.msk.f32.vlgmr.msrb.gmra.mxu3 %vm314_vm1, %v188_v12 }
  0xbb   :  { %288 = vrot.lane.b32.xlu0 %v223_v13, %s1361_s7 }
  0xbc   :  { %284 = vrot.lane.b32.xlu1 %v223_v13, %s1363_s24 }
  0xbe   :  { %v261_v43 = vpop.f32.mrf.mxu2 }
  0xbf   :  { %660 = vmatpush.msra.mxu3 %v261_v43  ;;  %v1507_v44 = vpack.i.bf16 %v258_v42, %v261_v43 }
  0xc1   :  { %266 = vrot.lane.b32.xlu2 %v188_v12, %s1362_s23  ;;  %661 = vmatpush.msra.mxu3 %v258_v42 }
  0xc2   :  { %995 = vmatmul.msk.f32.gmra.mxu3 %vm314_vm1, %v191_v14 }
  0xc3   :  { %280 = vrot.lane.b32.xlu0 %v223_v13, %s1362_s23 }
  0xc4   :  { %268 = vrot.lane.b32.xlu1 %v191_v14, %s1362_s23 }
  0xc9   :  { %272 = vrot.lane.b32.xlu2 %v191_v14, %s1363_s24 }
  0xcb   :  { %270 = vrot.lane.b32.xlu0 %v188_v12, %s1363_s24 }
 0x10b   :  { %v277_v22 = vpop.permute.xlu2 %276 }
 0x113   :  { %v287_v23 = vpop.permute.xlu2 %286 }
 0x114   :  { %1000 = vmatpush.xpose.msk.msrb.mxu1 %vm314_vm1, %v287_v23 }
 0x11b   :  { %v267_v30 = vpop.permute.xlu2 %266 }
 0x11c   :  { %v275_v24 = vpop.permute.xlu1 %274 }
 0x123   :  { %v273_v38 = vpop.permute.xlu2 %272 }
 0x125   :  { %v291_v25 = vpop.permute.xlu0 %290 }
 0x126   :  { %v283_v26 = vpop.permute.xlu1 %282  ;;  %1004 = vmatpush.xpose.msk.msrb.mxu2 %vm314_vm1, %v291_v25 }
 0x127   :  { %996 = vmatpush.xpose.msk.msrb.mxu0 %vm314_vm1, %v283_v26 }
 0x12d   :  { %v289_v27 = vpop.permute.xlu0 %288 }
 0x12e   :  { %v285_v28 = vpop.permute.xlu1 %284  ;;  %1005 = vmatpush.xpose.msk.msrb.mxu2 %vm314_vm1, %v289_v27 }
 0x12f   :  { %1001 = vmatpush.xpose.msk.msrb.mxu1 %vm314_vm1, %v285_v28 }
 0x131   :  { %1006 = vmatmul.msk.f32.vlgmr.msrb.gmra.mxu2 %vm314_vm1, %v275_v24 }
 0x135   :  { %v281_v29 = vpop.permute.xlu0 %280 }
 0x136   :  { %997 = vmatpush.xpose.msk.msrb.mxu0 %vm314_vm1, %v281_v29  ;;  %v269_v35 = vpop.permute.xlu1 %268 }
 0x139   :  { %998 = vmatmul.msk.f32.vlgmr.msrb.gmra.mxu0 %vm314_vm1, %v267_v30  ;;  %1007 = vmatmul.msk.f32.gmra.mxu2 %vm314_vm1, %v277_v22 }
 0x13d   :  { %v271_v32 = vpop.permute.xlu0 %270  ;;  %v340_v33 = vpop.f32.mrf.mxu3 }
 0x13e   :  { %v341_v34 = vadd.f32 %v340_v33, %v312_v31  ;;  %1002 = vmatmul.msk.f32.vlgmr.msrb.gmra.mxu1 %vm314_vm1, %v271_v32 }
 0x140   :  { %v440_v36 = vsel %vm439_vm2, %v341_v34, -inf }
 0x141   :  { %999 = vmatmul.msk.f32.gmra.mxu0 %vm314_vm1, %v269_v35  ;;  %441 = vmax.xlane.f32.xlu0 %v440_v36 }
 0x145   :  { %v343_v39 = vpop.f32.mrf.mxu3 }
 0x146   :  { %v344_v40 = vadd.f32 %v343_v39, %v313_v37  ;;  %1003 = vmatmul.msk.f32.gmra.mxu1 %vm314_vm1, %v273_v38 }
 0x148   :  { %v443_v41 = vsel %vm439_vm2, %v344_v40, -inf }
 0x149   :  { %444 = vmax.xlane.f32.xlu2 %v443_v41 }
 0x1b4   :  { %v433_v45 = vpop.f32.mrf.mxu2  ;;  %v442_v46 = vpop.xlane.xlu0 %441 }
 0x1b5   :  { %v434_v47 = vadd.f32 %v433_v45, %v312_v31  ;;  %v464_v48 = vsub.f32 %v341_v34, %v442_v46 }
 0x1b6   :  { %v371_v49 = vpop.f32.mrf.mxu0 }
 0x1b7   :  { %v372_v50 = vadd.f32 %v371_v49, %v312_v31  ;;  %v458_v51 = vsel %vm439_vm2, %v434_v47, -inf  ;;  %v472_v53 = vmul.f32 1.442695, %v464_v48 }
 0x1b8   :  { %459 = vmax.xlane.f32.xlu1 %v458_v51 }
 0x1b9   :  { %v446_v52 = vsel %vm439_vm2, %v372_v50, -inf  ;;  %1059 = vpow2.f32 %v472_v53 }
 0x1ba   :  { %447 = vmax.xlane.f32.xlu2 %v446_v52 }
 0x1bb   :  { %v402_v54 = vpop.f32.mrf.mxu1 }
 0x1bc   :  { %v403_v55 = vadd.f32 %v402_v54, %v312_v31  ;;  %v436_v56 = vpop.f32.mrf.mxu2  ;;  %v445_v57 = vpop.xlane.xlu2 %444 }
 0x1bd   :  { %v437_v58 = vadd.f32 %v436_v56, %v313_v37  ;;  %v465_v59 = vsub.f32 %v344_v40, %v445_v57 }
 0x1be   :  { %v374_v60 = vpop.f32.mrf.mxu0  ;;  %v452_v61 = vsel %vm439_vm2, %v403_v55, -inf }
 0x1bf   :  { %v375_v62 = vadd.f32 %v374_v60, %v313_v37  ;;  %v461_v63 = vsel %vm439_vm2, %v437_v58, -inf  ;;  %v474_v1 = vmul.f32 1.442695, %v465_v59  ;;  %v1514_v3 = vpop.eup %1059 }
 0x1c0   :  { %453 = vmax.xlane.f32.xlu1 %v452_v61  ;;  %462 = vmax.xlane.f32.xlu0 %v461_v63  ;;  %v488_v6 = vsel %vm439_vm2, %v1514_v3, 0.0 }
 0x1c1   :  { %v449_v0 = vsel %vm439_vm2, %v375_v62, -inf  ;;  %1061 = vpow2.f32 %v474_v1 }
 0x1c2   :  { %450 = vmax.xlane.f32.xlu2 %v449_v0 }
 0x1c3   :  { %v405_v2 = vpop.f32.mrf.mxu1 }
 0x1c4   :  { %v406_v4 = vadd.f32 %v405_v2, %v313_v37 }
 0x1c6   :  { %v455_v5 = vsel %vm439_vm2, %v406_v4, -inf }
 0x1c7   :  { %v1519_v7 = vpop.eup %1061 }
 0x1c8   :  { %456 = vmax.xlane.f32.xlu0 %v455_v5  ;;  %489 = vadd.xlane.f32.xlu1 %v488_v6  ;;  %v491_v10 = vsel %vm439_vm2, %v1519_v7, 0.0  ;;  %v756_v5 = vld [vmem:[#allocation14] sm:$0xff] }
 0x1c9   :  { %781 = vmatpush.msrb.mxu3 %v756_v5 }
 0x1d0   :  { %492 = vadd.xlane.f32.xlu0 %v491_v10 }
 0x22b   :  { %v460_v11 = vpop.xlane.xlu1 %459 }
 0x22c   :  { %v470_v12 = vsub.f32 %v434_v47, %v460_v11 }
 0x22d   :  { %v448_v13 = vpop.xlane.xlu2 %447 }
 0x22e   :  { %v484_v14 = vmul.f32 1.442695, %v470_v12  ;;  %v466_v15 = vsub.f32 %v372_v50, %v448_v13 }
 0x230   :  { %1063 = vpow2.f32 %v484_v14  ;;  %v476_v16 = vmul.f32 1.442695, %v466_v15 }
 0x232   :  { %1065 = vpow2.f32 %v476_v16 }
 0x233   :  { %v454_v17 = vpop.xlane.xlu1 %453  ;;  %v463_v18 = vpop.xlane.xlu0 %462 }
 0x234   :  { %v468_v19 = vsub.f32 %v403_v55, %v454_v17  ;;  %v471_v20 = vsub.f32 %v437_v58, %v463_v18 }
 0x235   :  { %v451_v21 = vpop.xlane.xlu2 %450 }
 0x236   :  { %v1523_v22 = vpop.eup %1063  ;;  %v480_v23 = vmul.f32 1.442695, %v468_v19  ;;  %v486_v24 = vmul.f32 1.442695, %v471_v20  ;;  %v467_v25 = vsub.f32 %v375_v62, %v451_v21 }
 0x237   :  { %v506_v26 = vsel %vm439_vm2, %v1523_v22, 0.0 }
 0x238   :  { %v1527_v27 = vpop.eup %1065  ;;  %1067 = vpow2.f32 %v480_v23  ;;  %v478_v28 = vmul.f32 1.442695, %v467_v25  ;;  %507 = vadd.xlane.f32.xlu2 %v506_v26 }
 0x239   :  { %1069 = vpow2.f32 %v486_v24  ;;  %v494_v29 = vsel %vm439_vm2, %v1527_v27, 0.0 }
 0x23a   :  { %1071 = vpow2.f32 %v478_v28  ;;  %495 = vadd.xlane.f32.xlu1 %v494_v29 }
 0x23b   :  { %v490_v30 = vpop.xlane.xlu1 %489  ;;  %v457_v31 = vpop.xlane.xlu0 %456 }
 0x23c   :  { %1073 = vrcp.f32 %v490_v30  ;;  %v469_v32 = vsub.f32 %v406_v4, %v457_v31  ;;  %v523_v45 = vand.u32 2147483648, %v490_v30  ;;  %v521_v48 = vand.u32 2147483647, %v490_v30 }
 0x23d   :  { %vm517_vm4 = vweird.f32 %v490_v30 }
 0x23e   :  { %v1531_v33 = vpop.eup %1067  ;;  %v482_v35 = vmul.f32 1.442695, %v469_v32  ;;  %v524_v52 = vor.u32 1.1754944e-38, %v523_v45  ;;  %vm522_vm6 = vcmp.eq.f32.partialorder %v521_v48, 8.507059e+37 }
 0x23f   :  { %v1533_v34 = vpop.eup %1069  ;;  %v500_v36 = vsel %vm439_vm2, %v1531_v33, 0.0 }
 0x240   :  { %v1537_v37 = vpop.eup %1071  ;;  %501 = vadd.xlane.f32.xlu0 %v500_v36  ;;  %v509_v38 = vsel %vm439_vm2, %v1533_v34, 0.0  ;;  %1075 = vpow2.f32 %v482_v35 }
 0x241   :  { %510 = vadd.xlane.f32.xlu2 %v509_v38  ;;  %v497_v39 = vsel %vm439_vm2, %v1537_v37, 0.0 }
 0x242   :  { %v1074_v40 = vpop.eup %1073  ;;  %498 = vadd.xlane.f32.xlu1 %v497_v39 }
 0x243   :  { %v513_v41 = vmul.f32 %v1074_v40, %v490_v30  ;;  %v493_v42 = vpop.xlane.xlu0 %492  ;;  %vm518_vm3 = vweird.f32 %v1074_v40 }
 0x244   :  { %1077 = vrcp.f32 %v493_v42  ;;  %vm519_vm5 = vmor %vm517_vm4, %vm518_vm3  ;;  %v538_v58 = vand.u32 2147483648, %v493_v42  ;;  %v536_v60 = vand.u32 2147483647, %v493_v42  ;;  %vm532_vm8 = vweird.f32 %v493_v42 }
 0x245   :  { %v514_v43 = vsub.f32 1.0, %v513_v41 }
 0x246   :  { %v1543_v46 = vpop.eup %1075  ;;  %v539_v62 = vor.u32 1.1754944e-38, %v538_v58  ;;  %vm537_vm10 = vcmp.eq.f32.partialorder %v536_v60, 8.507059e+37 }
 0x247   :  { %v515_v47 = vmul.f32 %v1074_v40, %v514_v43  ;;  %v503_v49 = vsel %vm439_vm2, %v1543_v46, 0.0 }
 0x248   :  { %504 = vadd.xlane.f32.xlu0 %v503_v49 }
 0x249   :  { %v516_v50 = vadd.f32 %v1074_v40, %v515_v47 }
 0x24a   :  { %v1078_v51 = vpop.eup %1077 }
 0x24b   :  { %v520_v53 = vsel %vm519_vm5, %v1074_v40, %v516_v50  ;;  %v528_v54 = vmul.f32 %v1078_v51, %v493_v42  ;;  %vm533_vm7 = vweird.f32 %v1078_v51 }
 0x24c   :  { %v525_v55 = vsel %vm522_vm6, %v524_v52, %v520_v53  ;;  %vm534_vm9 = vmor %vm532_vm8, %vm533_vm7 }
 0x24d   :  { %v529_v56 = vsub.f32 1.0, %v528_v54  ;;  %v526_v57 = vmul.f32 %v1514_v3, %v525_v55 }
 0x24f   :  { %v530_v59 = vmul.f32 %v1078_v51, %v529_v56  ;;  %632 = vst.msk [vmem:[#allocation17] sm:$0xff] %vm439_vm2, %v526_v57  ;;  %1008 = vmatmul.msk.f32.vlgmr.msra.gmra.mxu3 %vm439_vm2, %v526_v57 }
 0x251   :  { %v531_v61 = vadd.f32 %v1078_v51, %v530_v59 }
 0x253   :  { %v535_v63 = vsel %vm534_vm9, %v1078_v51, %v531_v61 }
 0x254   :  { %v540_v0 = vsel %vm537_vm10, %v539_v62, %v535_v63 }
 0x255   :  { %v541_v1 = vmul.f32 %v1519_v7, %v540_v0 }
 0x257   :  { %633 = vst.msk [vmem:[#allocation17 + $0x8] sm:$0xff] %vm439_vm2, %v541_v1  ;;  %1009 = vmatmul.msk.f32.gmra.mxu3 %vm439_vm2, %v541_v1 }
 0x259   :  { %1045 = vrot.lane.b32.xlu2 %v1507_v44, %s1361_s7 }
 0x25b   :  { %1050 = vrot.lane.b32.xlu1 %v1507_v44, %s1362_s23 }
 0x25c   :  { %1055 = vrot.lane.b32.xlu0 %v1507_v44, %s1363_s24 }
 0x2ab   :  { %v508_v2 = vpop.xlane.xlu2 %507 }
 0x2ac   :  { %1079 = vrcp.f32 %v508_v2  ;;  %v611_v11 = vand.u32 2147483647, %v508_v2  ;;  %v613_v14 = vand.u32 2147483648, %v508_v2  ;;  %vm607_vm12 = vweird.f32 %v508_v2 }
 0x2ad   :  { %v496_v3 = vpop.xlane.xlu1 %495 }
 0x2ae   :  { %1081 = vrcp.f32 %v496_v3  ;;  %v551_v16 = vand.u32 2147483647, %v496_v3  ;;  %v553_v17 = vand.u32 2147483648, %v496_v3  ;;  %vm1568_vm13 = vcmp.eq.f32.partialorder %v611_v11, 8.507059e+37 }
 0x2af   :  { %v614_v23 = vor.u32 1.1754944e-38, %v613_v14  ;;  %vm547_vm3 = vweird.f32 %v496_v3 }
 0x2b0   :  { %vm1572_vm4 = vcmp.eq.f32.partialorder %v551_v16, 8.507059e+37  ;;  %v554_v28 = vor.u32 1.1754944e-38, %v553_v17 }
 0x2b2   :  { %v1080_v4 = vpop.eup %1079 }
 0x2b3   :  { %v603_v6 = vmul.f32 %v1080_v4, %v508_v2  ;;  %v1559_v7 = vpop.xlane.xlu0 %501  ;;  %vm608_vm11 = vweird.f32 %v1080_v4 }
 0x2b4   :  { %v1082_v10 = vpop.eup %1081  ;;  %v1561_v12 = vpop.xlane.xlu2 %510  ;;  %1083 = vrcp.f32 %v1559_v7  ;;  %vm609_vm15 = vmor %vm607_vm12, %vm608_vm11  ;;  %vm577_vm5 = vweird.f32 %v1559_v7  ;;  %v581_v35 = vand.u32 2147483647, %v1559_v7  ;;  %v583_v40 = vand.u32 2147483648, %v1559_v7 }
 0x2b5   :  { %v604_v13 = vsub.f32 1.0, %v603_v6  ;;  %v543_v15 = vmul.f32 %v1082_v10, %v496_v3  ;;  %1085 = vrcp.f32 %v1561_v12  ;;  %v1565_v44 = vpop.xlane.xlu1 %498  ;;  %vm548_vm14 = vweird.f32 %v1082_v10 }
 0x2b6   :  { %1087 = vrcp.f32 %v1565_v44  ;;  %vm549_vm6 = vmor %vm547_vm3, %vm548_vm14  ;;  %v628_v39 = vand.u32 2147483648, %v1561_v12  ;;  %v626_v49 = vand.u32 2147483647, %v1561_v12  ;;  %vm622_vm9 = vweird.f32 %v1561_v12 }
 0x2b7   :  { %v605_v18 = vmul.f32 %v1080_v4, %v604_v13  ;;  %v544_v19 = vsub.f32 1.0, %v543_v15  ;;  %v584_v60 = vor.u32 1.1754944e-38, %v583_v40  ;;  %v568_v61 = vand.u32 2147483648, %v1565_v44 }
 0x2b8   :  { %v629_v63 = vor.u32 1.1754944e-38, %v628_v39  ;;  %vm582_vm12 = vcmp.eq.f32.partialorder %v581_v35, 8.507059e+37 }
 0x2b9   :  { %v606_v21 = vadd.f32 %v1080_v4, %v605_v18  ;;  %v545_v24 = vmul.f32 %v1082_v10, %v544_v19  ;;  %v569_v5 = vor.u32 1.1754944e-38, %v568_v61 }
 0x2ba   :  { %v1084_v25 = vpop.eup %1083 }
 0x2bb   :  { %v1086_v29 = vpop.eup %1085  ;;  %v610_v30 = vsel %vm609_vm15, %v1080_v4, %v606_v21  ;;  %v546_v31 = vadd.f32 %v1082_v10, %v545_v24  ;;  %v573_v32 = vmul.f32 %v1084_v25, %v1559_v7  ;;  %v1584_v42 = vpop.xlane.xlu0 %504  ;;  %vm578_vm7 = vweird.f32 %v1084_v25 }
 0x2bc   :  { %v615_v36 = vsel %vm1568_vm13, %v614_v23, %v610_v30  ;;  %v618_v38 = vmul.f32 %v1086_v29, %v1561_v12  ;;  %v1046_v41 = vpop.permute.xlu2 %1045  ;;  %v1088_v43 = vpop.eup %1087  ;;  %1089 = vrcp.f32 %v1584_v42  ;;  %vm623_vm8 = vweird.f32 %v1086_v29  ;;  %vm579_vm10 = vmor %vm577_vm5, %vm578_vm7  ;;  %v757_v30 = vld [vmem:[#allocation14 + $0x8] sm:$0xff] }
 0x2bd   :  { %v550_v45 = vsel %vm549_vm6, %v1082_v10, %v546_v31  ;;  %v574_v47 = vsub.f32 1.0, %v573_v32  ;;  %v1047_v48 = vunpack.i.l.bf16 %v1046_v41  ;;  %v558_v52 = vmul.f32 %v1088_v43, %v1565_v44  ;;  %vm624_vm14 = vmor %vm622_vm9, %vm623_vm8  ;;  %v758_v31 = vld [vmem:[#allocation14 + $0x10] sm:$0xff] }
 0x2be   :  { %v555_v50 = vsel %vm1572_vm4, %v554_v28, %v550_v45  ;;  %v619_v51 = vsub.f32 1.0, %v618_v38  ;;  %v1048_v54 = vunpack.i.h.bf16 %v1046_v41  ;;  %v616_v55 = vmul.f32 %v1523_v22, %v615_v36 }
 0x2bf   :  { %v575_v53 = vmul.f32 %v1084_v25, %v574_v47  ;;  %747 = vmatpush.msra.mxu2 %v1047_v48  ;;  %v559_v57 = vsub.f32 1.0, %v558_v52  ;;  %v556_v58 = vmul.f32 %v1527_v27, %v555_v50  ;;  %vm563_vm11 = vweird.f32 %v1088_v43 }
 0x2c0   :  { %v620_v56 = vmul.f32 %v1086_v29, %v619_v51  ;;  %638 = vst.msk [vmem:[#allocation17 + $0x30] sm:$0xff] %vm439_vm2, %v616_v55  ;;  %v566_v27 = vand.u32 2147483647, %v1565_v44  ;;  %vm562_vm13 = vweird.f32 %v1565_v44  ;;  %vm627_vm15 = vcmp.eq.f32.partialorder %v626_v49, 8.507059e+37 }
 0x2c1   :  { %v576_v59 = vadd.f32 %v1084_v25, %v575_v53  ;;  %748 = vmatpush.msra.mxu2 %v1048_v54  ;;  %v560_v62 = vmul.f32 %v1088_v43, %v559_v57  ;;  %634 = vst.msk [vmem:[#allocation17 + $0x10] sm:$0xff] %vm439_vm2, %v556_v58  ;;  %vm564_vm3 = vmor %vm562_vm13, %vm563_vm11  ;;  %v598_v15 = vand.u32 2147483648, %v1584_v42  ;;  %vm592_vm6 = vweird.f32 %v1584_v42 }
 0x2c2   :  { %1014 = vmatmul.msk.f32.vlgmr.msra.gmra.mxu2 %vm439_vm2, %v616_v55  ;;  %v621_v22 = vadd.f32 %v1086_v29, %v620_v56  ;;  %v1090_v1 = vpop.eup %1089  ;;  %vm567_vm4 = vcmp.eq.f32.partialorder %v566_v27, 8.507059e+37 }
 0x2c3   :  { %v580_v0 = vsel %vm579_vm10, %v1084_v25, %v576_v59  ;;  %v561_v4 = vadd.f32 %v1088_v43, %v560_v62  ;;  %v588_v6 = vmul.f32 %v1090_v1, %v1584_v42  ;;  %vm593_vm5 = vweird.f32 %v1090_v1 }
 0x2c4   :  { %v585_v2 = vsel %vm582_vm12, %v584_v60, %v580_v0  ;;  %v625_v3 = vsel %vm624_vm14, %v1086_v29, %v621_v22  ;;  %v599_v17 = vor.u32 1.1754944e-38, %v598_v15  ;;  %vm594_vm7 = vmor %vm592_vm6, %vm593_vm5 }
 0x2c5   :  { %v630_v7 = vsel %vm627_vm15, %v629_v63, %v625_v3  ;;  %v586_v10 = vmul.f32 %v1531_v33, %v585_v2  ;;  %v565_v13 = vsel %vm564_vm3, %v1088_v43, %v561_v4  ;;  %v589_v14 = vsub.f32 1.0, %v588_v6 }
 0x2c6   :  { %v631_v11 = vmul.f32 %v1533_v34, %v630_v7  ;;  %v570_v12 = vsel %vm567_vm4, %v569_v5, %v565_v13  ;;  %v596_v33 = vand.u32 2147483647, %v1584_v42  ;;  %v1364_v2 = vmov 32.0  }
 0x2c7   :  { %636 = vst.msk [vmem:[#allocation17 + $0x20] sm:$0xff] %vm439_vm2, %v586_v10  ;;  %v571_v44 = vmul.f32 %v1537_v37, %v570_v12  ;;  %v590_v16 = vmul.f32 %v1090_v1, %v589_v14  ;;  %1091 = vrcp.f32 %v1364_v2 }
 0x2c8   :  { %639 = vst.msk [vmem:[#allocation17 + $0x38] sm:$0xff] %vm439_vm2, %v631_v11  ;;  %vm597_vm8 = vcmp.eq.f32.partialorder %v596_v33, 8.507059e+37 }
 0x2c9   :  { %635 = vst.msk [vmem:[#allocation17 + $0x18] sm:$0xff] %vm439_vm2, %v571_v44  ;;  %v591_v34 = vadd.f32 %v1090_v1, %v590_v16 }
 0x2ca   :  { %1015 = vmatmul.msk.f32.gmra.mxu2 %vm439_vm2, %v631_v11 }
 0x2cb   :  { %v595_v19 = vsel %vm594_vm7, %v1090_v1, %v591_v34 }
 0x2cc   :  { %v600_v21 = vsel %vm597_vm8, %v599_v17, %v595_v19 }
 0x2cd   :  { %v1051_v18 = vpop.permute.xlu1 %1050  ;;  %v601_v37 = vmul.f32 %v1543_v46, %v600_v21  ;;  %v759_v46 = vld [vmem:[#allocation14 + $0x18] sm:$0xff]  ;;  %v1092_v3 = vpop.eup %1091 }
 0x2ce   :  { %v1052_v20 = vunpack.i.l.bf16 %v1051_v18  ;;  %v1056_v23 = vpop.permute.xlu0 %1055  ;;  %v1053_v24 = vunpack.i.h.bf16 %v1051_v18  ;;  %868 = vmatpush.msrb.mxu2 %v759_v46  ;;  %v899_v4 = vmul.f32 32.0, %v1092_v3 }
 0x2cf   :  { %v1057_v25 = vunpack.i.l.bf16 %v1056_v23  ;;  %637 = vst.msk [vmem:[#allocation17 + $0x28] sm:$0xff] %vm439_vm2, %v601_v37  ;;  %v1058_v26 = vunpack.i.h.bf16 %v1056_v23 }
 0x2d0   :  { %689 = vmatpush.msra.mxu0 %v1052_v20  ;;  %v900_v5 = vsub.f32 1.0, %v899_v4  ;;  %970 = dma.vmem_to_hbm [thread:$0]  %s963_s26, 1024, %s965_s28, [#allocation18], %s1352_s17, %s1352_s17, %s1353_s18  }
 0x2d1   :  { %718 = vmatpush.msra.mxu1 %v1057_v25 }
 0x2d2   :  { %v663_v28 = vpop.f32.mrf.mxu3  ;;  %690 = vmatpush.msra.mxu0 %v1053_v24  ;;  %v901_v6 = vmul.f32 %v1092_v3, %v900_v5 }
 0x2d3   :  { %1010 = vmatmul.msk.f32.vlgmr.msra.gmra.mxu0 %vm439_vm2, %v556_v58  ;;  %1016 = vmatmul.msk.f32.vlgmr.msrb.gmra.mxu3 %vm314_vm1, %v663_v28 }
 0x2d4   :  { %719 = vmatpush.msra.mxu1 %v1058_v26  ;;  %810 = vmatpush.msrb.mxu0 %v757_v30  ;;  %v902_v7 = vadd.f32 %v1092_v3, %v901_v6 }
 0x2d5   :  { %1012 = vmatmul.msk.f32.vlgmr.msra.gmra.mxu1 %vm439_vm2, %v586_v10 }
 0x2d6   :  { %839 = vmatpush.msrb.mxu1 %v758_v31 }
 0x2da   :  { %v666_v29 = vpop.f32.mrf.mxu3 }
 0x2db   :  { %1011 = vmatmul.msk.f32.gmra.mxu0 %vm439_vm2, %v571_v44  ;;  %1017 = vmatmul.msk.f32.gmra.mxu3 %vm314_vm1, %v666_v29 }
 0x2dd   :  { %1013 = vmatmul.msk.f32.gmra.mxu1 %vm439_vm2, %v601_v37 }
 0x345   :  { %v750_v32 = vpop.f32.mrf.mxu2 }
 0x346   :  { %1022 = vmatmul.msk.f32.vlgmr.msrb.gmra.mxu2 %vm314_vm1, %v750_v32 }
 0x34d   :  { %v753_v35 = vpop.f32.mrf.mxu2 }
 0x34e   :  { %1023 = vmatmul.msk.f32.gmra.mxu2 %vm314_vm1, %v753_v35 }
 0x350   :  { %v692_v36 = vpop.f32.mrf.mxu0 }
 0x351   :  { %1018 = vmatmul.msk.f32.vlgmr.msrb.gmra.mxu0 %vm314_vm1, %v692_v36 }
 0x352   :  { %v721_v38 = vpop.f32.mrf.mxu1 }
 0x353   :  { %1020 = vmatmul.msk.f32.vlgmr.msrb.gmra.mxu1 %vm314_vm1, %v721_v38 }
 0x356   :  { %v783_v41 = vpop.f32.mrf.mxu3 }
 0x357   :  { %v876_v45 = vsel %vm164_vm0, %v783_v41, 0.0 }
 0x358   :  { %v695_v39 = vpop.f32.mrf.mxu0 }
 0x359   :  { %1019 = vmatmul.msk.f32.gmra.mxu0 %vm314_vm1, %v695_v39 }
 0x35a   :  { %v724_v40 = vpop.f32.mrf.mxu1 }
 0x35b   :  { %1021 = vmatmul.msk.f32.gmra.mxu1 %vm314_vm1, %v724_v40  ;;  %vm903_vm1 = vweird.f32 %v1092_v3 }
 0x35c   :  { %v904_v10 = vsel %vm903_vm1, %v1092_v3, %v902_v7 }
 0x35e   :  { %v786_v53 = vpop.f32.mrf.mxu3 }
 0x35f   :  { %v883_v57 = vsel %vm164_vm0, %v786_v53, 0.0 }
 0x3c9   :  { %v870_v42 = vpop.f32.mrf.mxu2 }
 0x3ca   :  { %v881_v52 = vsel %vm164_vm0, %v870_v42, 0.0 }
 0x3ce   :  { %v812_v43 = vpop.f32.mrf.mxu0 }
 0x3cf   :  { %v877_v47 = vsel %vm164_vm0, %v812_v43, 0.0 }
 0x3d0   :  { %v878_v48 = vadd.f32 %v877_v47, %v876_v45  ;;  %v841_v49 = vpop.f32.mrf.mxu1 }
 0x3d1   :  { %v879_v50 = vsel %vm164_vm0, %v841_v49, 0.0  ;;  %v873_v59 = vpop.f32.mrf.mxu2 }
 0x3d2   :  { %v880_v51 = vadd.f32 %v879_v50, %v878_v48  ;;  %v888_v63 = vsel %vm164_vm0, %v873_v59, 0.0 }
 0x3d4   :  { %v882_v54 = vadd.f32 %v881_v52, %v880_v51 }
 0x3d6   :  { %v815_v55 = vpop.f32.mrf.mxu0  ;;  %v890_v56 = vadd.f32 %v882_v54, %v1465_v8 }
 0x3d7   :  { %v884_v58 = vsel %vm164_vm0, %v815_v55, 0.0 }
 0x3d8   :  { %v885_v60 = vadd.f32 %v884_v58, %v883_v57  ;;  %v844_v61 = vpop.f32.mrf.mxu1  ;;  %v892_v62 = vsel %vm164_vm0, %v890_v56, 0.0 }
 0x3d9   :  { %v886_v22 = vsel %vm164_vm0, %v844_v61, 0.0  ;;  %893 = vadd.xlane.f32.xlu2 %v892_v62 }
 0x3da   :  { %v887_v27 = vadd.f32 %v886_v22, %v885_v60 }
 0x3dc   :  { %v889_v0 = vadd.f32 %v888_v63, %v887_v27 }
 0x3de   :  { %v891_v1 = vadd.f32 %v889_v0, %v1467_v9 }
 0x3e0   :  { %v895_v8 = vsel %vm164_vm0, %v891_v1, 0.0 }
 0x3e1   :  { %896 = vadd.xlane.f32.xlu1 %v895_v8 }
 0x44c   :  { %v894_v11 = vpop.xlane.xlu2 %893 }
 0x44d   :  { %v905_v13 = vmul.f32 %v904_v10, %v894_v11 }
 0x44f   :  { %v907_v14 = vsub.f32 %v890_v56, %v905_v13 }
 0x451   :  { %v909_v12 = vmul.f32 %v907_v14, %v907_v14 }
 0x453   :  { %v911_v15 = vsel %vm164_vm0, %v909_v12, 0.0 }
 0x454   :  { %912 = vadd.xlane.f32.xlu0 %v911_v15  ;;  %v897_v9 = vpop.xlane.xlu1 %896 }
 0x455   :  { %v906_v44 = vmul.f32 %v904_v10, %v897_v9 }
 0x457   :  { %v908_v16 = vsub.f32 %v891_v1, %v906_v44 }
 0x459   :  { %v910_v33 = vmul.f32 %v908_v16, %v908_v16 }
 0x45b   :  { %v914_v34 = vsel %vm164_vm0, %v910_v33, 0.0 }
 0x45c   :  { %915 = vadd.xlane.f32.xlu2 %v914_v34 }
 0x4c7   :  { %v913_v17 = vpop.xlane.xlu0 %912 }
 0x4c8   :  { %v917_v18 = vmul.f32 %v913_v17, %v904_v10 }
 0x4ca   :  { %v919_v19 = vadd.f32 1e-05, %v917_v18 }
 0x4cc   :  { %1093 = vrsqrt.f32 %v919_v19  ;;  %vm927_vm9 = vweird.f32 %v919_v19 }
 0x4cf   :  { %v916_v20 = vpop.xlane.xlu2 %915 }
 0x4d0   :  { %v918_v21 = vmul.f32 %v916_v20, %v904_v10 }
 0x4d2   :  { %v1094_v23 = vpop.eup %1093  ;;  %v920_v37 = vadd.f32 1e-05, %v918_v21 }
 0x4d3   :  { %v922_v24 = vmul.f32 %v1094_v23, %v919_v19  ;;  %vm928_vm2 = vweird.f32 %v1094_v23 }
 0x4d4   :  { %1095 = vrsqrt.f32 %v920_v37  ;;  %vm929_vm10 = vmor %vm927_vm9, %vm928_vm2  ;;  %vm937_vm12 = vweird.f32 %v920_v37 }
 0x4d5   :  { %v923_v25 = vmul.f32 %v1094_v23, %v922_v24 }
 0x4d7   :  { %v924_v26 = vmul.f32 0.5, %v923_v25 }
 0x4d9   :  { %v925_v28 = vsub.f32 1.5, %v924_v26 }
 0x4da   :  { %v1096_v29 = vpop.eup %1095 }
 0x4db   :  { %v926_v46 = vmul.f32 %v1094_v23, %v925_v28  ;;  %v932_v30 = vmul.f32 %v1096_v29, %v920_v37  ;;  %vm938_vm11 = vweird.f32 %v1096_v29 }
 0x4dc   :  { %vm939_vm13 = vmor %vm937_vm12, %vm938_vm11 }
 0x4dd   :  { %v930_v31 = vsel %vm929_vm10, %v1094_v23, %v926_v46  ;;  %v933_v32 = vmul.f32 %v1096_v29, %v932_v30 }
 0x4de   :  { %v941_v35 = vmul.f32 %v930_v31, %v907_v14 }
 0x4df   :  { %v934_v36 = vmul.f32 0.5, %v933_v32 }
 0x4e0   :  { %943 = vst.msk [vmem:[#allocation16] sm:$0xff] %vm164_vm0, %v941_v35 }
 0x4e1   :  { %v935_v38 = vsub.f32 1.5, %v934_v36 }
 0x4e3   :  { %v936_v39 = vmul.f32 %v1096_v29, %v935_v38 }
 0x4e5   :  { %v940_v40 = vsel %vm939_vm13, %v1096_v29, %v936_v39 }
 0x4e6   :  { %v942_v41 = vmul.f32 %v940_v40, %v908_v16 }
 0x4e8   :  { %944 = vst.msk [vmem:[#allocation16 + $0x8] sm:$0xff] %vm164_vm0, %v942_v41 }
 0x4e9   :  { %957 = dma.vmem_to_hbm [thread:$0]  %s950_s29, 256, %s952_s10, [#allocation4], %s1352_s17, %s1352_s17, %s1353_s18  }
 0x4ea   :  { %1347 = dma.done.wait [#allocation4], 256  }
 0x4eb   :  { %1348 = vsyncadd [#allocation4], 4294967040 }
 0x4ec   :  { %1349 = dma.done.wait [#allocation18], 1024  }
 0x4ed   :  { %1350 = vsyncadd [#allocation18], 4294966272 }
 0x4ee   :  { %979 = vsyncpa [#allocation3], 1 }
 0x4ef   :  { %980 = vsyncpa [#allocation6], 1 }
 0x4f0   :  { %981 = vsyncpa [#allocation9], 1 }
 0x4f1   :  { %982 = vsyncpa [#allocation12], 1 }
 0x4f2   :  { %983 = vsyncpa [#allocation15], 1 }
 0x4f3   :  { %984 = vsyncpa [#allocation4], 1 }
 0x4f4   :  { %985 = vsyncpa [#allocation18], 1 }

</bundles_post_ra>
